<compile_context>
chip_gen: v6e
topology: v6e:2x2x1
jax: 0.10.0
libtpu: 0.0.40
codegen_flags: <defaults>
</compile_context>

<pallas_src>
import math

import jax
import jax.numpy as jnp
from jax.experimental import pallas as pl
from jax.experimental.pallas import tpu as pltpu


def _round_up(x: int, m: int) -> int:
    return ((x + m - 1) // m) * m


def _cdiv(a: int, b: int) -> int:
    return (a + b - 1) // b


def _pos_enc_kernel(nl_ref, sel_ref, freq_ref, phase_ref, out_ref):
    # nl_ref   : (TILE_R, fold)       f32 -- fold noise levels per output row
    # sel_ref  : (fold, fold*dim)     f32 -- 0/1 lane-expansion matrix
    # freq_ref : (1, fold*dim)        f32 -- per-lane frequency table
    # phase_ref: (1, fold*dim)        f32 -- 0.0 (sin lanes) / pi/2 (cos lanes)
    # out_ref  : (TILE_R, fold*dim)   f32 -- lane-dense output slab
    fold = nl_ref.shape[1]
    if fold == 1:
        nl_x = nl_ref[...]                        # (TILE_R, 1) lane-broadcast
    else:
        # MXU is otherwise idle: expand each noise level across its dim lanes.
        nl_x = jnp.dot(nl_ref[...], sel_ref[...],
                       preferred_element_type=jnp.float32)
    # cos(x) == sin(x + pi/2): whole tile assembled with one full-width store.
    out_ref[...] = jnp.sin(nl_x * freq_ref[...] + phase_ref[...])


def positional_encoding(noise_level: jax.Array, dim: int, *,
                        max_tile_rows: int = 2048,
                        vmem_budget_bytes: int = 16 * 1024 * 1024) -> jax.Array:
    """noise_level: (B,) -> (B, dim) float32, matching PyTorch PositionalEncoding."""
    assert dim % 2 == 0, "dim must be even"
    count = dim // 2
    B = noise_level.shape[0]

    # Fold factor: guarantee the kernel output last dim is >= 128 lanes.
    fold = 1 if dim >= 128 else _cdiv(128, dim)
    assert fold * dim >= 128

    rows = _cdiv(B, fold)

    # Tile rows from a VMEM budget (double-buffered output slab <= budget).
    row_bytes = fold * dim * 4
    tile_cap = max(8, 8 * (vmem_budget_bytes // (8 * 2 * row_bytes)))
    tile_r = min(max_tile_rows, tile_cap, _round_up(rows, 8))
    tile_r = max(8, (tile_r // 8) * 8)
    # Ensure >= 2 grid steps when possible so the "parallel" batch axis can
    # shard across both TensorCores on v7x (harmless on v5e/v6e).
    if _round_up(rows, tile_r) == tile_r and tile_r > 8:
        tile_r = max(8, _round_up(tile_r // 2, 8))

    rows_pad = _round_up(rows, tile_r)
    b_pad = rows_pad * fold

    nl = noise_level.astype(jnp.float32)
    if b_pad != B:
        nl = jnp.pad(nl, (0, b_pad - B))
    nl2d = nl.reshape(rows_pad, fold)

    # Hoisted constants (static per dim / fold).
    step = jnp.arange(count, dtype=jnp.float32) / jnp.float32(count)
    freq_half = jnp.exp(jnp.float32(-math.log(10000.0)) * step)          # (count,)
    freq_dim = jnp.concatenate([freq_half, freq_half])                    # (dim,)
    phase_dim = jnp.concatenate([jnp.zeros((count,), jnp.float32),
                                 jnp.full((count,), 0.5 * math.pi,
                                          dtype=jnp.float32)])            # (dim,)
    freq_row = jnp.tile(freq_dim, (fold,)).reshape(1, fold * dim)
    phase_row = jnp.tile(phase_dim, (fold,)).reshape(1, fold * dim)
    sel = jnp.repeat(jnp.eye(fold, dtype=jnp.float32), dim, axis=1)       # (fold, fold*dim)

    grid = (rows_pad // tile_r,)
    out = pl.pallas_call(
        _pos_enc_kernel,
        out_shape=jax.ShapeDtypeStruct((rows_pad, fold * dim), jnp.float32),
        grid=grid,
        in_specs=[
            pl.BlockSpec((tile_r, fold), lambda i: (i, 0)),
            pl.BlockSpec((fold, fold * dim), lambda i: (0, 0)),
            pl.BlockSpec((1, fold * dim), lambda i: (0, 0)),
            pl.BlockSpec((1, fold * dim), lambda i: (0, 0)),
        ],
        out_specs=pl.BlockSpec((tile_r, fold * dim), lambda i: (i, 0)),
        compiler_params=pltpu.CompilerParams(
            dimension_semantics=("parallel",),
            vmem_limit_bytes=32 * 1024 * 1024,
        ),
    )(nl2d, sel, freq_row, phase_row)

    # Contiguous (row-major) reshape back to per-batch-row layout, drop padding.
    return out.reshape(b_pad, dim)[:B]


def _reference(noise_level: jax.Array, dim: int) -> jax.Array:
    count = dim // 2
    step = jnp.arange(count, dtype=noise_level.dtype) / count
    enc = noise_level[:, None] * jnp.exp(-math.log(10000.0) * step[None, :])
    return jnp.concatenate([jnp.sin(enc), jnp.cos(enc)], axis=-1)


if __name__ == "__main__":
    key = jax.random.PRNGKey(0)

    # dim < 128 path (fold > 1, MXU lane-expansion).
    B, dim = 8, 64
    noise_level = jax.random.uniform(key, (B,), dtype=jnp.float32)
    out = positional_encoding(noise_level, dim)
    jax.block_until_ready(out)
    ref = _reference(noise_level, dim)
    assert out.shape == (B, dim)
    assert jnp.allclose(out, ref, atol=1e-5, rtol=1e-5), "mismatch vs reference (dim=64)"

    # Batch not a multiple of fold / tile alignment.
    B2 = 13
    nl2 = jax.random.uniform(jax.random.PRNGKey(1), (B2,), dtype=jnp.float32)
    out2 = positional_encoding(nl2, dim)
    jax.block_until_ready(out2)
    assert jnp.allclose(out2, _reference(nl2, dim), atol=1e-5, rtol=1e-5), "mismatch (B=13)"

    # dim >= 128 path (fold == 1), non-multiple-of-128 lane width.
    B3, dim3 = 13, 192
    nl3 = jax.random.uniform(jax.random.PRNGKey(2), (B3,), dtype=jnp.float32)
    out3 = positional_encoding(nl3, dim3)
    jax.block_until_ready(out3)
    assert jnp.allclose(out3, _reference(nl3, dim3), atol=1e-5, rtol=1e-5), "mismatch (dim=192)"

    print("KERNEL_OK")
</pallas_src>

<mosaic_0001>
module attributes {stable_mosaic.version = 11 : i64} {
  func.func @_pos_enc_kernel(%arg0: i32, %arg1: memref<8x2xf32, #tpu.memory_space<vmem>>, %arg2: memref<2x128xf32, #tpu.memory_space<vmem>>, %arg3: memref<1x128xf32, #tpu.memory_space<vmem>>, %arg4: memref<1x128xf32, #tpu.memory_space<vmem>>, %arg5: memref<8x128xf32, #tpu.memory_space<vmem>>) attributes {dimension_semantics = [#tpu.dimension_semantics<parallel>], iteration_bounds = array<i64: 1>, scalar_prefetch = 0 : i64, scratch_operands = 0 : i64, tpu.core_type = #tpu.core_type<tc>, window_params = [{transform_indices = @transform_0, window_bounds = array<i64: 8, 2>}, {pipeline_mode = #tpu.pipeline_mode<synchronous>, transform_indices = @transform_1, window_bounds = array<i64: 2, 128>}, {pipeline_mode = #tpu.pipeline_mode<synchronous>, transform_indices = @transform_2, window_bounds = array<i64: 1, 128>}, {pipeline_mode = #tpu.pipeline_mode<synchronous>, transform_indices = @transform_3, window_bounds = array<i64: 1, 128>}, {transform_indices = @transform_4, window_bounds = array<i64: 8, 128>}]} {
    %c0 = arith.constant 0 : index
    %c0_0 = arith.constant 0 : index
    %0 = vector.load %arg1[%c0, %c0_0] : memref<8x2xf32, #tpu.memory_space<vmem>>, vector<8x2xf32>
    %c0_1 = arith.constant 0 : index
    %c0_2 = arith.constant 0 : index
    %1 = vector.load %arg2[%c0_1, %c0_2] : memref<2x128xf32, #tpu.memory_space<vmem>>, vector<2x128xf32>
    %cst = arith.constant dense<0.000000e+00> : vector<8x128xf32>
    %2 = tpu.matmul %0, %1, %cst {dimension_numbers = #tpu.dot_dimension_numbers<[1], [0], [0], [1], [0, 0, 1, 1], [], []>} : vector<8x2xf32>, vector<2x128xf32>, vector<8x128xf32> -> vector<8x128xf32>
    %c0_3 = arith.constant 0 : index
    %c0_4 = arith.constant 0 : index
    %3 = vector.load %arg3[%c0_3, %c0_4] : memref<1x128xf32, #tpu.memory_space<vmem>>, vector<1x128xf32>
    %4 = vector.broadcast %3 : vector<1x128xf32> to vector<8x128xf32>
    %5 = arith.mulf %2, %4 : vector<8x128xf32>
    %c0_5 = arith.constant 0 : index
    %c0_6 = arith.constant 0 : index
    %6 = vector.load %arg4[%c0_5, %c0_6] : memref<1x128xf32, #tpu.memory_space<vmem>>, vector<1x128xf32>
    %7 = vector.broadcast %6 : vector<1x128xf32> to vector<8x128xf32>
    %8 = arith.addf %5, %7 : vector<8x128xf32>
    %9 = math.sin %8 : vector<8x128xf32>
    %c0_7 = arith.constant 0 : index
    %c0_8 = arith.constant 0 : index
    %10 = vector.load %arg5[%c0_7, %c0_8] : memref<8x128xf32, #tpu.memory_space<vmem>>, vector<8x128xf32>
    tpu.vector_store %arg5[%c0_7, %c0_8], %9 {strides = array<i32>} : memref<8x128xf32, #tpu.memory_space<vmem>>, vector<8x128xf32>,
    return
  }
  func.func @transform_0(%arg0: i32) -> (i32, i32) {
    %c0_i32 = arith.constant 0 : i32
    %c0_i32_0 = arith.constant 0 : i32
    return %arg0, %c0_i32 : i32, i32
  }
  func.func @transform_1(%arg0: i32) -> (i32, i32) {
    %c0_i32 = arith.constant 0 : i32
    %c0_i32_0 = arith.constant 0 : i32
    %c0_i32_1 = arith.constant 0 : i32
    return %c0_i32, %c0_i32_0 : i32, i32
  }
  func.func @transform_2(%arg0: i32) -> (i32, i32) {
    %c0_i32 = arith.constant 0 : i32
    %c0_i32_0 = arith.constant 0 : i32
    %c0_i32_1 = arith.constant 0 : i32
    return %c0_i32, %c0_i32_0 : i32, i32
  }
  func.func @transform_3(%arg0: i32) -> (i32, i32) {
    %c0_i32 = arith.constant 0 : i32
    %c0_i32_0 = arith.constant 0 : i32
    %c0_i32_1 = arith.constant 0 : i32
    return %c0_i32, %c0_i32_0 : i32, i32
  }
  func.func @transform_4(%arg0: i32) -> (i32, i32) {
    %c0_i32 = arith.constant 0 : i32
    %c0_i32_0 = arith.constant 0 : i32
    return %arg0, %c0_i32 : i32, i32
  }
}

</mosaic_0001>

<bundles_post_ra>
// kernel: tpu_custom_call.1
= control target key start
LH: loop header
LB: loop body
LE: loop exit
PB: predicated region body
PF: predicated region fallthrough
CT: control target
= control target key end

     0   :  { %vm24_vm0 = vcmask 1041408   ;;  %v287_v2 = vmov 0.0   ;;  %vm288_vm1 = vmmov 0   ;;  %vm20_vm2 = vcmask 15360   ;;  %s357_s0 = inlined_call_operand.vmem [shape: f32[8,2], index: 0, kind: input, shape index: {}]   ;;  %s358_s1 = inlined_call_operand.vmem [shape: f32[2,128], index: 1, kind: input, shape index: {}]   ;;  %s359_s2 = inlined_call_operand.vmem [shape: f32[1,128], index: 2, kind: input, shape index: {}]   ;;  %s360_s3 = inlined_call_operand.vmem [shape: f32[1,128], index: 3, kind: input, shape index: {}]   ;;  %s361_s4 = inlined_call_operand.hbm [shape: f32[8,128], index: 4, kind: output, shape index: {}]  }
   0x1   :  { %v19_v0 = vld [vmem:[%s358_s1] sm:$0x3]  ;;  %243 = vmatprep.subr.mxu0 %v287_v2  ;;  %245 = vmatprep.mubr.msk.f32.mxu0 %vm288_vm1, %v287_v2 }
   0x2   :  { %v18_v1 = vld [vmem:[%s357_s0] sm:$0xff] }
   0x3   :  { %9 = vsyncpa [#allocation3], 0  ;;  %244 = vmatpush3.msk.msra.mxu0 %vm24_vm0, %v19_v0  ;;  %v235_v3 = vld [vmem:[%s359_s2] ss:$0 sm:$0xff]  ;;  %v289_v20 = vmov 2102212464  }
   0x4   :  { %246 = vmatmul.mubr.msk.f32.vlgmr.msra.gmra.mxu0 %vm20_vm2, %v18_v1  ;;  %v236_v5 = vld [vmem:[%s360_s3] ss:$0 sm:$0xff]  ;;  %v290_v22 = vmov 920167782   ;;  %v291_v26 = vmov 1326507024  }
   0x5   :  { %v292_v28 = vmov 683565275   ;;  %v293_v30 = vmov 2475754826   ;;  %v294_v33 = vmov 2131351028  }
   0x6   :  { %s295_s0 = smov [#allocation2]  }
   0x7   :  { %s225_s2 = sshll.u32 %s295_s0, 4  ;;  %s226_s2 = int_to_ptr.vmem [resolvable:$true] %s225_s2 }
   0x8   :  { %s265_s3 = scalar_lea.vmem %s226_s2, 128  ;;  %p270_p1 = scmp.lt.s32.totalorder %s226_s2, %s226_s2 }
   0x9   :  { %p266_p0 = scmp.ne.s32.totalorder %s226_s2, %s265_s3  ;;  %p271_p2 = scmp.lt.s32.totalorder %s265_s3, %s265_s3 }
   0xb   :  { %p272_p3 = por %p271_p2, %p270_p1 }
   0xd   :  { %p273_p4 = pnand %p272_p3, %p266_p0 }
  0xc4   :  { %v94_v4 = vpop.f32.mrf.mxu0 }
  0xc5   :  { %v105_v6 = vmul.f32 %v235_v3, %v94_v4 }
  0xc6   :  { %v247_v7 = vpop.f32.mrf.mxu0 }
  0xc7   :  { %v333_v8 = vadd.f32 %v236_v5, %v105_v6 }
  0xc9   :  { %v117_v9 = vand.u32 2139095040, %v333_v8  ;;  %v114_v10 = vand.u32 2147483647, %v333_v8  ;;  %vm116_vm10 = vcmp.lt.s32.totalorder %v333_v8, 0  ;;  %vm206_vm15 = vweird.f32 %v333_v8 }
  0xcb   :  { %v118_v11 = vshrl.u32 %v117_v9, 23  ;;  %v121_v13 = vand.u32 8388607, %v114_v10  ;;  %vm115_vm11 = vcmp.le.f32.partialorder %v114_v10, 0.7853982 }
  0xcd   :  { %v237_v12 = vadd.s32 4294967169, %v118_v11  ;;  %v122_v16 = vor.u32 8388608, %v121_v13 }
  0xcf   :  { %v124_v14 = vadd.s32 1, %v237_v12  ;;  %v162_v24 = vshll.u32 %v122_v16, 8 }
  0xd1   :  { %vm125_vm3 = vcmp.gt.s32.totalorder %v124_v14, 0 }
  0xd2   :  { %v126_v15 = vsel %vm125_vm3, %v124_v14, 0 }
  0xd3   :  { %v128_v17 = vand.u32 31, %v126_v15  ;;  %v127_v18 = vshrl.u32 %v126_v15, 5 }
  0xd5   :  { %v129_v19 = vsub.s32 32, %v128_v17  ;;  %v140_v21 = vshll.u32 %v289_v20, %v128_v17  ;;  %v143_v23 = vshll.u32 %v290_v22, %v128_v17  ;;  %v131_v29 = vshll.u32 %v292_v28, %v128_v17 }
  0xd6   :  { %v134_v32 = vshll.u32 %v293_v30, %v128_v17  ;;  %v137_v35 = vshll.u32 %v294_v33, %v128_v17  ;;  %vm149_vm4 = vcmp.lt.s32.totalorder %v127_v18, 4  ;;  %vm146_vm5 = vcmp.lt.s32.totalorder %v127_v18, 1 }
  0xd7   :  { %v141_v25 = vshrl.u32 %v290_v22, %v129_v19  ;;  %v144_v27 = vshrl.u32 %v291_v26, %v129_v19  ;;  %v132_v31 = vshrl.u32 %v293_v30, %v129_v19  ;;  %v135_v34 = vshrl.u32 %v294_v33, %v129_v19 }
  0xd8   :  { %v138_v36 = vshrl.u32 %v289_v20, %v129_v19  ;;  %v130_v40 = vshrl.u32 %v292_v28, %v129_v19  ;;  %vm147_vm6 = vcmp.lt.s32.totalorder %v127_v18, 2  ;;  %vm148_vm7 = vcmp.lt.s32.totalorder %v127_v18, 3 }
  0xd9   :  { %v142_v37 = vor.u32 %v141_v25, %v140_v21  ;;  %v145_v38 = vor.u32 %v144_v27, %v143_v23  ;;  %v133_v39 = vor.u32 %v132_v31, %v131_v29  ;;  %v136_v41 = vor.u32 %v135_v34, %v134_v32 }
  0xda   :  { %v139_v42 = vor.u32 %v138_v36, %v137_v35 }
  0xdb   :  { %v155_v43 = vsel %vm149_vm4, %v142_v37, 920167782  ;;  %v159_v44 = vsel %vm149_vm4, %v145_v38, 1326507024  ;;  %v154_v46 = vsel %vm146_vm5, %v133_v39, %v136_v41  ;;  %v150_v49 = vsel %vm146_vm5, %v130_v40, %v133_v39 }
  0xdc   :  { %v151_v45 = vsel %vm149_vm4, %v139_v42, 2102212464  ;;  %v156_v47 = vsel %vm148_vm7, %v139_v42, %v155_v43  ;;  %v158_v48 = vsel %vm146_vm5, %v136_v41, %v139_v42  ;;  %v160_v52 = vsel %vm148_vm7, %v142_v37, %v159_v44 }
  0xdd   :  { %v152_v50 = vsel %vm148_vm7, %v136_v41, %v151_v45  ;;  %v157_v51 = vsel %vm147_vm6, %v154_v46, %v156_v47  ;;  %v161_v53 = vsel %vm147_vm6, %v158_v48, %v160_v52 }
  0xde   :  { %v339_v54 = vmul.u32.u64.low %v162_v24, %v157_v51  ;;  %v340_v55 = vmul.u32.u64.high %v162_v24, %v157_v51, %v339_v54  ;;  %v342_v56 = vmul.u32.u64.low %v162_v24, %v161_v53  ;;  %v343_v57 = vmul.u32.u64.high %v162_v24, %v161_v53, %v342_v56 }
  0xdf   :  { %v153_v58 = vsel %vm147_vm6, %v150_v49, %v152_v50 }
  0xe0   :  { %v172_v59 = vadd.s32 1, %v340_v55  ;;  %v169_v60 = vmul.u32 %v162_v24, %v153_v58  ;;  %vm171_vm8 = vc.u32 %v343_v57, %v339_v54  ;;  %v170_v9 = vadd.s32 %v339_v54, %v343_v57 }
  0xe2   :  { %v173_v61 = vsel %vm171_vm8, %v172_v59, %v340_v55 }
  0xe3   :  { %v174_v62 = vadd.s32 %v173_v61, %v169_v60 }
  0xe5   :  { %v175_v63 = vadd.s32 536870912, %v174_v62 }
  0xe7   :  { %v176_v0 = vshrl.u32 %v175_v63, 30 }
  0xe9   :  { %v177_v1 = vshll.u32 %v176_v0, 30  ;;  %v200_v23 = vsub.s32 4, %v176_v0 }
  0xeb   :  { %v178_v2 = vsub.s32 %v174_v62, %v177_v1  ;;  %v201_v26 = vsel %vm116_vm10, %v200_v23, %v176_v0 }
  0xec   :  { %v203_v27 = vsel %vm115_vm11, 0, %v201_v26 }
  0xed   :  { %v180_v3 = vsub.s32 0, %v178_v2  ;;  %v207_v28 = vadd.s32 3, %v203_v27 }
  0xef   :  { %v238_v4 = vmin.u32 %v180_v3, %v178_v2  ;;  %v208_v29 = vand.u32 3, %v207_v28 }
  0xf1   :  { %v182_v5 = vclz %v238_v4  ;;  %vm213_vm12 = vcmp.eq.s32.totalorder %v208_v29, 2  ;;  %vm210_vm13 = vcmp.eq.s32.totalorder %v208_v29, 0  ;;  %vm209_vm14 = vcmp.lt.s32.totalorder %v208_v29, 2 }
  0xf3   :  { %v239_v6 = vadd.s32 4294967294, %v182_v5 }
  0xf5   :  { %vm240_vm9 = vcmp.lt.s32.totalorder %v239_v6, 0 }
  0xf6   :  { %v185_v7 = vsel %vm240_vm9, 0, %v239_v6 }
  0xf7   :  { %v186_v11 = vsub.s32 32, %v185_v7  ;;  %v190_v12 = vsub.s32 4294967266, %v185_v7  ;;  %v187_v13 = vshll.u32 %v178_v2, %v185_v7 }
  0xf9   :  { %v188_v14 = vshrl.u32 %v170_v9, %v186_v11  ;;  %v191_v15 = vadd.s32 127, %v190_v12 }
  0xfb   :  { %v189_v16 = vor.u32 %v188_v14, %v187_v13  ;;  %v192_v17 = vshll.u32 %v191_v15, 23 }
  0xfd   :  { %v193_v18 = vor.u32 4788187, %v192_v17  ;;  %v196_v20 = vcvt.s32.f32 %v189_v16 }
  0xff   :  { %v194_v19 = vand.u32 2147483647, %v193_v18 }
 0x101   :  { %v197_v21 = vmul.f32 %v196_v20, %v194_v19 }
 0x103   :  { %v198_v22 = vxor.u32 2147483648, %v197_v21 }
 0x105   :  { %v199_v24 = vsel %vm116_vm10, %v198_v22, %v197_v21 }
 0x106   :  { %v202_v25 = vsel %vm115_vm11, %v333_v8, %v199_v24 }
 0x107   :  { %261 = vcosq.f32 %v202_v25 }
 0x108   :  { %263 = vsinq.f32 %v202_v25 }
 0x114   :  { %v262_v30 = vpop.eup %261 }
 0x115   :  { %v264_v31 = vpop.eup %263  ;;  %v214_v32 = vxor.u32 2147483648, %v262_v30 }
 0x116   :  { %v211_v33 = vxor.u32 2147483648, %v264_v31 }
 0x117   :  { %v215_v34 = vsel %vm213_vm12, %v214_v32, %v264_v31 }
 0x118   :  { %v212_v10 = vsel %vm210_vm13, %v262_v30, %v211_v33 }
 0x119   :  { %v216_v35 = vsel %vm209_vm14, %v212_v10, %v215_v34 }
 0x11a   :  { %v217_v36 = vsel %vm206_vm15, nan, %v216_v35 }
 0x11b   :  { %218 = vst [vmem:[#allocation2] sm:$0xff] %v217_v36 }
 0x11c   :  { %276 = shalt.err (!%p273_p4)
}
 0x11d   :  { %228 = dma.vmem_to_hbm [thread:$0]  %s226_s2, 128, %s361_s4, [#allocation3]  }
 0x11e   :  { %285 = dma.done.wait [#allocation3], 128  }
 0x11f   :  { %286 = vsyncadd [#allocation3], 4294967168 }
 0x120   :  { %232 = vsyncpa [#allocation3], 1 }

</bundles_post_ra>
